<compile_context>
chip_gen: v6e
topology: v6e:2x2x1
jax: 0.10.0
libtpu: 0.0.40
codegen_flags: <defaults>
</compile_context>

<pallas_src>
from functools import partial

import jax
import jax.numpy as jnp
from jax import lax
from jax.experimental import pallas as pl
from jax.experimental.pallas import tpu as pltpu


def _round_up(n, m):
    return ((n + m - 1) // m) * m


def _make_kernel(sub, n_sub):
    """Build the kernel for a tile of n_sub * sub rows (both static Python ints)."""

    def _chunk(r, x_ref, w1, b1, w2, b2, w3, b3, o_ref):
        # Layer 1: Linear(F, 64) + ReLU. bf16 operands, f32 accumulation; the bf16
        # cast of x happens here (in-kernel VPU pack, no wrapper HBM pass).
        xb = x_ref[pl.ds(r, sub), :].astype(jnp.bfloat16)
        h1 = jnp.dot(xb, w1, preferred_element_type=jnp.float32)
        h1 = jnp.maximum(h1 + b1, 0.0)

        # Layer 2: Linear(64, 128) + ReLU.
        h2 = jnp.dot(h1.astype(jnp.bfloat16), w2,
                     preferred_element_type=jnp.float32)
        h2 = jnp.maximum(h2 + b2, 0.0)

        # Layer 3: Linear(128, 1) on the VPU/XLU (broadcast-multiply + lane reduce).
        # Avoids a per-tile MXU weight reload / h2 transpose for ~1% of the FLOPs.
        y = jnp.sum(h2 * w3, axis=-1, keepdims=True) + b3
        o_ref[pl.ds(r, sub), :] = y.astype(o_ref.dtype)

    def kernel(x_ref, w1_ref, b1_ref, w2_ref, b2_ref, w3_ref, b3_ref, o_ref):
        # Hoist resident weight/bias loads out of the sub-chunk loop.
        w1 = w1_ref[...]          # (F, 64)   bf16
        b1 = b1_ref[...]          # (1, 64)   f32
        w2 = w2_ref[...]          # (64, 128) bf16
        b2 = b2_ref[...]          # (1, 128)  f32
        w3 = w3_ref[...]          # (1, 128)  f32
        b3 = b3_ref[0]            # scalar    f32 (SMEM)

        if n_sub == 1:
            _chunk(0, x_ref, w1, b1, w2, b2, w3, b3, o_ref)
        else:
            def body(s, carry):
                r = pl.multiple_of(s * sub, sub)
                _chunk(r, x_ref, w1, b1, w2, b2, w3, b3, o_ref)
                return carry
            # Short, fixed trip count -> unroll so the LLO scheduler sees it all.
            lax.fori_loop(0, n_sub, body, 0, unroll=True)

    return kernel


@partial(jax.jit, static_argnames=("tm_max", "sub_rows"))
def atoms_feat_forward(x, params, *, tm_max=2048, sub_rows=256):
    """Runs the AtomsFeat MLP on x of shape (N, F). Returns (N, 1) float32."""
    w1, b1, w2, b2, w3, b3 = params
    N, F = x.shape

    # --- tile selection (all static: derived from shapes) ---------------------------
    n16 = _round_up(N, 16)
    if n16 <= sub_rows:
        # Tiny batch: one tile covering the (minimally padded) batch, no inner loop.
        tm = n16
        sub = n16
    else:
        # Aim for ~4 grid tiles (v7x megacore + pipeline depth), but keep each tile
        # >= 256 rows so per-grid-step overhead (~0.35 us) stays negligible, and a
        # multiple of the 256-row sub-chunk.
        target = _round_up((n16 + 3) // 4, sub_rows)
        tm = max(sub_rows, min(_round_up(tm_max, sub_rows), target))
        sub = sub_rows
    n_sub = tm // sub
    n_tiles = pl.cdiv(N, tm)
    n_pad = n_tiles * tm

    # f32 x goes straight to the kernel (bf16 cast happens in-kernel).
    if n_pad != N:
        x = jnp.pad(x, ((0, n_pad - N), (0, 0)))   # fuses under jit

    # Weights are tiny: cast once in the (jitted) wrapper.
    w1_bf = w1.astype(jnp.bfloat16)
    w2_bf = w2.astype(jnp.bfloat16)
    b3_s = b3.reshape((1,)).astype(jnp.float32)     # scalar via SMEM

    full = lambda arr: pl.BlockSpec(arr.shape, lambda i: (0, 0))  # resident in VMEM

    out = pl.pallas_call(
        _make_kernel(sub, n_sub),
        out_shape=jax.ShapeDtypeStruct((n_pad, 1), jnp.float32),
        grid_spec=pltpu.PrefetchScalarGridSpec(
            num_scalar_prefetch=0,
            grid=(n_tiles,),
            in_specs=[
                pl.BlockSpec((tm, F), lambda i: (i, 0)),             # x row tile (f32)
                full(w1_bf), full(b1),                               # layer 1 params
                full(w2_bf), full(b2),                               # layer 2 params
                full(w3),                                            # layer 3 weight (1, 128)
                pl.BlockSpec(memory_space=pltpu.MemorySpace.SMEM),   # layer 3 bias scalar
            ],
            out_specs=pl.BlockSpec((tm, 1), lambda i: (i, 0)),       # natural (N,1) layout
        ),
        compiler_params=pltpu.CompilerParams(
            dimension_semantics=("parallel",),   # megacore sharding on v7x
        ),
    )(x, w1_bf, b1, w2_bf, b2, w3, b3_s)

    return out[:N]


def init_params(key, feature_num):
    """Deterministic synthetic parameters matching nn.Linear shapes.

    w1/w2 are stored transposed (in, out) so the kernel computes x @ W + b;
    w3 is kept in the PyTorch (out=1, in=128) layout and used as a row vector.
    """
    k1, k2, k3, k4, k5, k6 = jax.random.split(key, 6)
    scale = 0.1
    w1 = scale * jax.random.normal(k1, (feature_num, 64), jnp.float32)
    b1 = scale * jax.random.normal(k2, (1, 64), jnp.float32)
    w2 = scale * jax.random.normal(k3, (64, 128), jnp.float32)
    b2 = scale * jax.random.normal(k4, (1, 128), jnp.float32)
    w3 = scale * jax.random.normal(k5, (1, 128), jnp.float32)
    b3 = scale * jax.random.normal(k6, (1,), jnp.float32)
    return (w1, b1, w2, b2, w3, b3)


def reference_forward(x, params):
    """Pure-JAX f32 reference (mirrors PyTorch semantics)."""
    w1, b1, w2, b2, w3, b3 = params
    h1 = jnp.maximum(x @ w1 + b1, 0.0)
    h2 = jnp.maximum(h1 @ w2 + b2, 0.0)
    return h2 @ w3.T + b3


if __name__ == "__main__":
    key = jax.random.PRNGKey(0)
    kx, kp = jax.random.split(key)

    feature_num = 32
    batch = 300          # deliberately not a multiple of the row tile

    x = jax.random.normal(kx, (batch, feature_num), jnp.float32)
    params = init_params(kp, feature_num)

    out = atoms_feat_forward(x, params)
    out = jax.block_until_ready(out)

    ref = reference_forward(x, params)
    assert out.shape == (batch, 1)
    # bf16 MXU inputs (f32 accumulation) -> relaxed tolerance vs the f32 reference.
    assert jnp.allclose(out, ref, atol=3e-2, rtol=3e-2), "mismatch vs reference"

    print("KERNEL_OK")
</pallas_src>

<mosaic_0001>
module attributes {stable_mosaic.version = 11 : i64} {
  func.func @kernel(%arg0: i32, %arg1: memref<256x32xf32, #tpu.memory_space<vmem>>, %arg2: memref<32x64xbf16, #tpu.memory_space<vmem>>, %arg3: memref<1x64xf32, #tpu.memory_space<vmem>>, %arg4: memref<64x128xbf16, #tpu.memory_space<vmem>>, %arg5: memref<1x128xf32, #tpu.memory_space<vmem>>, %arg6: memref<1x128xf32, #tpu.memory_space<vmem>>, %arg7: memref<1xf32, #tpu.memory_space<smem>>, %arg8: memref<256x1xf32, #tpu.memory_space<vmem>>) attributes {dimension_semantics = [#tpu.dimension_semantics<parallel>], iteration_bounds = array<i64: 2>, scalar_prefetch = 0 : i64, scratch_operands = 0 : i64, tpu.core_type = #tpu.core_type<tc>, window_params = [{transform_indices = @transform_0, window_bounds = array<i64: 256, 32>}, {pipeline_mode = #tpu.pipeline_mode<synchronous>, transform_indices = @transform_1, window_bounds = array<i64: 32, 64>}, {pipeline_mode = #tpu.pipeline_mode<synchronous>, transform_indices = @transform_2, window_bounds = array<i64: 1, 64>}, {pipeline_mode = #tpu.pipeline_mode<synchronous>, transform_indices = @transform_3, window_bounds = array<i64: 64, 128>}, {pipeline_mode = #tpu.pipeline_mode<synchronous>, transform_indices = @transform_4, window_bounds = array<i64: 1, 128>}, {pipeline_mode = #tpu.pipeline_mode<synchronous>, transform_indices = @transform_5, window_bounds = array<i64: 1, 128>}, {transform_indices = @transform_6, window_bounds = array<i64: 1>}, {transform_indices = @transform_7, window_bounds = array<i64: 256, 1>}]} {
    %c0 = arith.constant 0 : index
    %c0_0 = arith.constant 0 : index
    %0 = vector.load %arg2[%c0, %c0_0] : memref<32x64xbf16, #tpu.memory_space<vmem>>, vector<32x64xbf16>
    %c0_1 = arith.constant 0 : index
    %c0_2 = arith.constant 0 : index
    %1 = vector.load %arg3[%c0_1, %c0_2] : memref<1x64xf32, #tpu.memory_space<vmem>>, vector<1x64xf32>
    %c0_3 = arith.constant 0 : index
    %c0_4 = arith.constant 0 : index
    %2 = vector.load %arg4[%c0_3, %c0_4] : memref<64x128xbf16, #tpu.memory_space<vmem>>, vector<64x128xbf16>
    %c0_5 = arith.constant 0 : index
    %c0_6 = arith.constant 0 : index
    %3 = vector.load %arg5[%c0_5, %c0_6] : memref<1x128xf32, #tpu.memory_space<vmem>>, vector<1x128xf32>
    %c0_7 = arith.constant 0 : index
    %c0_8 = arith.constant 0 : index
    %4 = vector.load %arg6[%c0_7, %c0_8] : memref<1x128xf32, #tpu.memory_space<vmem>>, vector<1x128xf32>
    %c0_9 = arith.constant 0 : index
    %5 = memref.load %arg7[%c0_9] : memref<1xf32, #tpu.memory_space<smem>>
    %c0_10 = arith.constant 0 : index
    %c0_11 = arith.constant 0 : index
    %6 = vector.load %arg1[%c0_10, %c0_11] : memref<256x32xf32, #tpu.memory_space<vmem>>, vector<256x32xf32>
    %7 = arith.truncf %6 : vector<256x32xf32> to vector<256x32xbf16>
    %cst = arith.constant dense<0.000000e+00> : vector<256x64xf32>
    %8 = tpu.matmul %7, %0, %cst {dimension_numbers = #tpu.dot_dimension_numbers<[1], [0], [0], [1], [0, 0, 1, 1], [], []>} : vector<256x32xbf16>, vector<32x64xbf16>, vector<256x64xf32> -> vector<256x64xf32>
    %9 = vector.broadcast %1 : vector<1x64xf32> to vector<256x64xf32>
    %10 = arith.addf %8, %9 : vector<256x64xf32>
    %cst_12 = arith.constant 0.000000e+00 : f32
    %11 = vector.broadcast %cst_12 : f32 to vector<256x64xf32>
    %12 = arith.maximumf %10, %11 : vector<256x64xf32>
    %13 = arith.truncf %12 : vector<256x64xf32> to vector<256x64xbf16>
    %cst_13 = arith.constant dense<0.000000e+00> : vector<256x128xf32>
    %14 = tpu.matmul %13, %2, %cst_13 {dimension_numbers = #tpu.dot_dimension_numbers<[1], [0], [0], [1], [0, 0, 1, 1], [], []>} : vector<256x64xbf16>, vector<64x128xbf16>, vector<256x128xf32> -> vector<256x128xf32>
    %15 = vector.broadcast %3 : vector<1x128xf32> to vector<256x128xf32>
    %16 = arith.addf %14, %15 : vector<256x128xf32>
    %cst_14 = arith.constant 0.000000e+00 : f32
    %17 = vector.broadcast %cst_14 : f32 to vector<256x128xf32>
    %18 = arith.maximumf %16, %17 : vector<256x128xf32>
    %19 = vector.broadcast %4 : vector<1x128xf32> to vector<256x128xf32>
    %20 = arith.mulf %18, %19 : vector<256x128xf32>
    %cst_15 = arith.constant dense<0.000000e+00> : vector<256xf32>
    %21 = vector.multi_reduction <add>, %20, %cst_15 [1] : vector<256x128xf32> to vector<256xf32>
    %22 = vector.shape_cast %21 : vector<256xf32> to vector<256x1xf32>
    %23 = vector.broadcast %5 : f32 to vector<256x1xf32>
    %24 = arith.addf %22, %23 : vector<256x1xf32>
    %c0_16 = arith.constant 0 : index
    %c0_17 = arith.constant 0 : index
    %25 = vector.load %arg8[%c0_16, %c0_17] : memref<256x1xf32, #tpu.memory_space<vmem>>, vector<256x1xf32>
    tpu.vector_store %arg8[%c0_16, %c0_17], %24 {strides = array<i32>} : memref<256x1xf32, #tpu.memory_space<vmem>>, vector<256x1xf32>,
    return
  }
  func.func @transform_0(%arg0: i32) -> (i32, i32) {
    %c0_i32 = arith.constant 0 : i32
    %c0_i32_0 = arith.constant 0 : i32
    return %arg0, %c0_i32 : i32, i32
  }
  func.func @transform_1(%arg0: i32) -> (i32, i32) {
    %c0_i32 = arith.constant 0 : i32
    %c0_i32_0 = arith.constant 0 : i32
    %c0_i32_1 = arith.constant 0 : i32
    return %c0_i32, %c0_i32_0 : i32, i32
  }
  func.func @transform_2(%arg0: i32) -> (i32, i32) {
    %c0_i32 = arith.constant 0 : i32
    %c0_i32_0 = arith.constant 0 : i32
    %c0_i32_1 = arith.constant 0 : i32
    return %c0_i32, %c0_i32_0 : i32, i32
  }
  func.func @transform_3(%arg0: i32) -> (i32, i32) {
    %c0_i32 = arith.constant 0 : i32
    %c0_i32_0 = arith.constant 0 : i32
    %c0_i32_1 = arith.constant 0 : i32
    return %c0_i32, %c0_i32_0 : i32, i32
  }
  func.func @transform_4(%arg0: i32) -> (i32, i32) {
    %c0_i32 = arith.constant 0 : i32
    %c0_i32_0 = arith.constant 0 : i32
    %c0_i32_1 = arith.constant 0 : i32
    return %c0_i32, %c0_i32_0 : i32, i32
  }
  func.func @transform_5(%arg0: i32) -> (i32, i32) {
    %c0_i32 = arith.constant 0 : i32
    %c0_i32_0 = arith.constant 0 : i32
    %c0_i32_1 = arith.constant 0 : i32
    return %c0_i32, %c0_i32_0 : i32, i32
  }
  func.func @transform_6(%arg0: i32) -> i32 {
    %c0_i32 = arith.constant 0 : i32
    %c0_i32_0 = arith.constant 0 : i32
    return %c0_i32 : i32
  }
  func.func @transform_7(%arg0: i32) -> (i32, i32) {
    %c0_i32 = arith.constant 0 : i32
    %c0_i32_0 = arith.constant 0 : i32
    return %arg0, %c0_i32 : i32, i32
  }
}

</mosaic_0001>

<bundles_post_ra>
// kernel: atoms_feat_forward.1
= control target key start
LH: loop header
LB: loop body
LE: loop exit
PB: predicated region body
PF: predicated region fallthrough
CT: control target
= control target key end

     0   :  { %s1351_s26 = smov 0   ;;  %s1670_s0 = inlined_call_operand.vmem [shape: f32[512,32], index: 0, kind: input, shape index: {}]   ;;  %s1671_s1 = inlined_call_operand.vmem [shape: bf16[32,64], index: 1, kind: input, shape index: {}]   ;;  %s1672_s2 = inlined_call_operand.vmem [shape: f32[1,64], index: 2, kind: input, shape index: {}]   ;;  %s1673_s3 = inlined_call_operand.vmem [shape: bf16[64,128], index: 3, kind: input, shape index: {}]   ;;  %s1674_s4 = inlined_call_operand.vmem [shape: f32[1,128], index: 4, kind: input, shape index: {}]   ;;  %s1675_s5 = inlined_call_operand.vmem [shape: f32[1,128], index: 5, kind: input, shape index: {}]   ;;  %s1676_s6 = inlined_call_operand.<no memory space> [shape: f32[1], index: 6, kind: input, shape index: {}]   ;;  %s1677_s7 = inlined_call_operand.vmem [shape: f32[512,1], index: 7, kind: output, shape index: {}]  }
   0x1   :  { %12 = sst [smem:[#allocation2]] %s1676_s6 }
   0x2 LB: > { %s1120_s27 = sadd.s32 4294967295, %s1306_s26   ;;  %p1124_p0 = scmp.ge.s32.totalorder %s1306_s26, 1  ;;  %s1306_s26 = sphi %s1351_s26, %s18_s26  }
   0x3   : > { %p239_p1 = scmp.lt.s32.totalorder %s1306_s26, 3 }
   0x5   : > { %p240_p2 = pnand %p1124_p0, %p239_p1 }
   0x6   : > { %s1125_s6 = sshll.u32 (!%p240_p2), %s1120_s27, 5  ;;  %s299_s28 = sld [smem:[#allocation2]] (!%p240_p2) }
   0x7   : > { %243 = sbr.rel (%p240_p2) target bundleno = 633 (0x279), region = 48  ;;  %p272_p3 = scmp.lt.s32.totalorder (!%p240_p2), %s1125_s6, 63 }
   0xc   : > { %v1294_v0 = vld [vmem:[%s1671_s1 + $0x8] sm:$0xff]   ;;  %v1295_v1 = vld [vmem:[%s1671_s1] sm:$0xff]   ;;  %v1296_v2 = vld [vmem:[%s1673_s3 + $0x18] sm:$0xff]   ;;  %s1679_s6 = smov (!%p272_p3, %s1125_s6), 63  ;;  %vm366_vm0 = vcmask 261120   ;;  %vm654_vm1 = vcmask 523264  }
   0xd   : > { %1210 = vmatprep.subr.bf16.mxu0 %v1294_v0  ;;  %1246 = vmatprep.subr.bf16.mxu1 %v1296_v2  ;;  %s1126_s11 = sshll.u32 %s1679_s6, 3  ;;  %v1297_v51 = vld [vmem:[%s1673_s3 + $0x10] sm:$0xff]   ;;  %v1298_v52 = vld [vmem:[%s1673_s3 + $0x8] sm:$0xff]   ;;  %v1299_v53 = vld [vmem:[%s1673_s3] sm:$0xff]   ;;  %vm1031_vm2 = vcmask 7168  }
   0xe   : > { %1211 = vmatpush3.bf16.msra.mxu0 %v1294_v0  ;;  %1247 = vmatpush3.bf16.msra.mxu1 %v1296_v2  ;;  %s1376_s14 = scalar_lea.vmem %s1670_s0, %s1126_s11  ;;  %v1438_v56 = vld [vmem:[%s1672_s2] ss:$0 sm:$0xff]  ;;  %s1569_s8 = scalar_lea.vmem %s1677_s7, %s1126_s11 }
   0xf   : > { %1212 = vmatprep.subr.bf16.mxu0 %v1295_v1  ;;  %v300_v3 = vld [vmem:[%s1376_s14] sm:$0xff]  ;;  %v301_v4 = vld [vmem:[%s1376_s14 + $0x8] sm:$0xff]  ;;  %v302_v5 = vld [vmem:[%s1376_s14 + $0x10] sm:$0xff]  ;;  %1248 = vmatprep.subr.bf16.mxu1 %v1297_v51 }
  0x10   : > { %v332_v6 = vpack.c.bf16 %v301_v4, %v300_v3  ;;  %v303_v7 = vld [vmem:[%s1376_s14 + $0x18] sm:$0xff]  ;;  %v304_v8 = vld [vmem:[%s1376_s14 + $0x20] sm:$0xff]  ;;  %v305_v9 = vld [vmem:[%s1376_s14 + $0x28] sm:$0xff] }
  0x11   : > { %v333_v10 = vpack.c.bf16 %v303_v7, %v302_v5  ;;  %v334_v11 = vpack.c.bf16 %v305_v9, %v304_v8  ;;  %v306_v12 = vld [vmem:[%s1376_s14 + $0x30] sm:$0xff]  ;;  %v307_v13 = vld [vmem:[%s1376_s14 + $0x38] sm:$0xff]  ;;  %v308_v14 = vld [vmem:[%s1376_s14 + $0x40] sm:$0xff] }
  0x12   : > { %1213 = vmatpush3.bf16.msra.mxu0 %v1295_v1  ;;  %1214 = vmatprep.mubr.msk.bf16.mxu0 %vm366_vm0, %v332_v6  ;;  %v309_v15 = vld [vmem:[%s1376_s14 + $0x48] sm:$0xff]  ;;  %v335_v16 = vpack.c.bf16 %v307_v13, %v306_v12  ;;  %v310_v18 = vld [vmem:[%s1376_s14 + $0x50] sm:$0xff]  ;;  %v311_v19 = vld [vmem:[%s1376_s14 + $0x58] sm:$0xff] }
  0x13   : > { %v336_v17 = vpack.c.bf16 %v309_v15, %v308_v14  ;;  %v312_v20 = vld [vmem:[%s1376_s14 + $0x60] sm:$0xff]  ;;  %v313_v21 = vld [vmem:[%s1376_s14 + $0x68] sm:$0xff]  ;;  %v337_v22 = vpack.c.bf16 %v311_v19, %v310_v18  ;;  %v314_v24 = vld [vmem:[%s1376_s14 + $0x70] sm:$0xff]  ;;  %1249 = vmatpush3.bf16.msra.mxu1 %v1297_v51 }
  0x14   : > { %v338_v23 = vpack.c.bf16 %v313_v21, %v312_v20  ;;  %v315_v25 = vld [vmem:[%s1376_s14 + $0x78] sm:$0xff]  ;;  %v316_v26 = vld [vmem:[%s1376_s14 + $0x80] sm:$0xff]  ;;  %v317_v27 = vld [vmem:[%s1376_s14 + $0x88] sm:$0xff]  ;;  %1250 = vmatprep.subr.bf16.mxu1 %v1298_v52 }
  0x15   : > { %1215 = vmatmul.mubr.msk.bf16.vlgmr.msra.gmra.mxu0 %vm366_vm0, %v333_v10  ;;  %v339_v28 = vpack.c.bf16 %v315_v25, %v314_v24  ;;  %v340_v29 = vpack.c.bf16 %v317_v27, %v316_v26  ;;  %v318_v30 = vld [vmem:[%s1376_s14 + $0x90] sm:$0xff]  ;;  %v319_v31 = vld [vmem:[%s1376_s14 + $0x98] sm:$0xff]  ;;  %v320_v32 = vld [vmem:[%s1376_s14 + $0xa0] sm:$0xff] }
  0x16   : > { %1218 = vmatprep.mubr.msk.bf16.mxu0 %vm366_vm0, %v334_v11  ;;  %v321_v33 = vld [vmem:[%s1376_s14 + $0xa8] sm:$0xff]  ;;  %v341_v34 = vpack.c.bf16 %v319_v31, %v318_v30  ;;  %v322_v36 = vld [vmem:[%s1376_s14 + $0xb0] sm:$0xff]  ;;  %v323_v37 = vld [vmem:[%s1376_s14 + $0xb8] sm:$0xff] }
  0x17   : > { %v342_v35 = vpack.c.bf16 %v321_v33, %v320_v32  ;;  %v324_v38 = vld [vmem:[%s1376_s14 + $0xc0] sm:$0xff]  ;;  %v325_v39 = vld [vmem:[%s1376_s14 + $0xc8] sm:$0xff]  ;;  %v343_v40 = vpack.c.bf16 %v323_v37, %v322_v36  ;;  %v326_v42 = vld [vmem:[%s1376_s14 + $0xd0] sm:$0xff]  ;;  %1251 = vmatpush3.bf16.msra.mxu1 %v1298_v52 }
  0x18   : > { %v344_v41 = vpack.c.bf16 %v325_v39, %v324_v38  ;;  %v327_v43 = vld [vmem:[%s1376_s14 + $0xd8] sm:$0xff]  ;;  %v328_v44 = vld [vmem:[%s1376_s14 + $0xe0] sm:$0xff]  ;;  %v329_v45 = vld [vmem:[%s1376_s14 + $0xe8] sm:$0xff]  ;;  %1252 = vmatprep.subr.bf16.mxu1 %v1299_v53 }
  0x19   : > { %v345_v46 = vpack.c.bf16 %v327_v43, %v326_v42  ;;  %v346_v47 = vpack.c.bf16 %v329_v45, %v328_v44  ;;  %v330_v48 = vld [vmem:[%s1376_s14 + $0xf0] sm:$0xff]  ;;  %v331_v49 = vld [vmem:[%s1376_s14 + $0xf8] sm:$0xff] }
  0x1a   : > { %v347_v50 = vpack.c.bf16 %v331_v49, %v330_v48 }
  0x1b   : > { %1253 = vmatpush3.bf16.msra.mxu1 %v1299_v53 }
  0x1d   : > { %1219 = vmatmul.mubr.msk.bf16.gmra.mxu0 %vm366_vm0, %v335_v16 }
  0x1e   : > { %1222 = vmatprep.mubr.msk.bf16.mxu0 %vm366_vm0, %v336_v17 }
  0x25   : > { %1223 = vmatmul.mubr.msk.bf16.gmra.mxu0 %vm366_vm0, %v337_v22 }
  0x26   : > { %1226 = vmatprep.mubr.msk.bf16.mxu0 %vm366_vm0, %v338_v23 }
  0x2d   : > { %1227 = vmatmul.mubr.msk.bf16.gmra.mxu0 %vm366_vm0, %v339_v28 }
  0x2e   : > { %1230 = vmatprep.mubr.msk.bf16.mxu0 %vm366_vm0, %v340_v29 }
  0x35   : > { %1231 = vmatmul.mubr.msk.bf16.gmra.mxu0 %vm366_vm0, %v341_v34 }
  0x36   : > { %1234 = vmatprep.mubr.msk.bf16.mxu0 %vm366_vm0, %v342_v35 }
  0x3d   : > { %1235 = vmatmul.mubr.msk.bf16.gmra.mxu0 %vm366_vm0, %v343_v40 }
  0x3e   : > { %1238 = vmatprep.mubr.msk.bf16.mxu0 %vm366_vm0, %v344_v41 }
  0x45   : > { %1239 = vmatmul.mubr.msk.bf16.gmra.mxu0 %vm366_vm0, %v345_v46 }
  0x46   : > { %1242 = vmatprep.mubr.msk.bf16.mxu0 %vm366_vm0, %v346_v47 }
  0x4d   : > { %1243 = vmatmul.mubr.msk.bf16.gmra.mxu0 %vm366_vm0, %v347_v50 }
  0xd5   : > { %v1216_v54 = vpop.f32.mrf.mxu0 }
  0xd6   : > { %v458_v60 = vadd.f32 %v1216_v54, %v1438_v56 }
  0xd7   : > { %v449_v55 = vpop.f32.mrf.mxu0 }
  0xd8   : > { %v450_v58 = vadd.f32 %v1438_v56, %v449_v55  ;;  %v578_v3 = vmax.f32 %v458_v60, 0.0 }
  0xd9   : > { %v1217_v57 = vpop.f32.mrf.mxu0 }
  0xda   : > { %v461_v59 = vadd.f32 %v1217_v57, %v1438_v56  ;;  %v576_v1 = vmax.f32 %v450_v58, 0.0 }
  0xdb   : > { %v452_v61 = vpop.f32.mrf.mxu0 }
  0xdc   : > { %v453_v62 = vadd.f32 %v1438_v56, %v452_v61  ;;  %v579_v63 = vmax.f32 %v461_v59, 0.0 }
  0xdd   : > { %v1220_v0 = vpop.f32.mrf.mxu0 }
  0xde   : > { %v577_v2 = vmax.f32 %v453_v62, 0.0  ;;  %v609_v6 = vpack.c.bf16 %v579_v63, %v578_v3  ;;  %v474_v10 = vadd.f32 %v1220_v0, %v1438_v56 }
  0xdf   : > { %v465_v4 = vpop.f32.mrf.mxu0 }
  0xe0   : > { %v608_v5 = vpack.c.bf16 %v577_v2, %v576_v1  ;;  %v466_v8 = vadd.f32 %v1438_v56, %v465_v4  ;;  %v582_v17 = vmax.f32 %v474_v10, 0.0 }
  0xe1   : > { %v1221_v7 = vpop.f32.mrf.mxu0 }
  0xe2   : > { %v477_v9 = vadd.f32 %v1221_v7, %v1438_v56  ;;  %1254 = vmatprep.mubr.msk.bf16.mxu1 %vm654_vm1, %v608_v5  ;;  %v580_v15 = vmax.f32 %v466_v8, 0.0 }
  0xe3   : > { %v468_v11 = vpop.f32.mrf.mxu0  ;;  %1255 = vmatmul.mubr.msk.bf16.vlgmr.msra.gmra.mxu1 %vm654_vm1, %v609_v6 }
  0xe4   : > { %v469_v12 = vadd.f32 %v1438_v56, %v468_v11  ;;  %v583_v13 = vmax.f32 %v477_v9, 0.0 }
  0xe5   : > { %v1224_v14 = vpop.f32.mrf.mxu0 }
  0xe6   : > { %v581_v16 = vmax.f32 %v469_v12, 0.0  ;;  %v611_v20 = vpack.c.bf16 %v583_v13, %v582_v17  ;;  %v490_v24 = vadd.f32 %v1224_v14, %v1438_v56 }
  0xe7   : > { %v481_v18 = vpop.f32.mrf.mxu0 }
  0xe8   : > { %v610_v19 = vpack.c.bf16 %v581_v16, %v580_v15  ;;  %v482_v22 = vadd.f32 %v1438_v56, %v481_v18  ;;  %v586_v31 = vmax.f32 %v490_v24, 0.0 }
  0xe9   : > { %v1225_v21 = vpop.f32.mrf.mxu0 }
  0xea   : > { %v493_v23 = vadd.f32 %v1225_v21, %v1438_v56  ;;  %1258 = vmatprep.mubr.msk.bf16.mxu1 %vm654_vm1, %v610_v19  ;;  %v584_v29 = vmax.f32 %v482_v22, 0.0 }
  0xeb   : > { %v484_v25 = vpop.f32.mrf.mxu0  ;;  %1259 = vmatmul.mubr.msk.bf16.gmra.mxu1 %vm654_vm1, %v611_v20 }
  0xec   : > { %v485_v26 = vadd.f32 %v1438_v56, %v484_v25  ;;  %v587_v27 = vmax.f32 %v493_v23, 0.0 }
  0xed   : > { %v1228_v28 = vpop.f32.mrf.mxu0 }
  0xee   : > { %v585_v30 = vmax.f32 %v485_v26, 0.0  ;;  %v613_v34 = vpack.c.bf16 %v587_v27, %v586_v31  ;;  %v506_v38 = vadd.f32 %v1228_v28, %v1438_v56 }
  0xef   : > { %v497_v32 = vpop.f32.mrf.mxu0 }
  0xf0   : > { %v612_v33 = vpack.c.bf16 %v585_v30, %v584_v29  ;;  %v498_v36 = vadd.f32 %v1438_v56, %v497_v32  ;;  %v590_v45 = vmax.f32 %v506_v38, 0.0 }
  0xf1   : > { %v1229_v35 = vpop.f32.mrf.mxu0 }
  0xf2   : > { %v509_v37 = vadd.f32 %v1229_v35, %v1438_v56  ;;  %1262 = vmatprep.mubr.msk.bf16.mxu1 %vm654_vm1, %v612_v33  ;;  %v588_v43 = vmax.f32 %v498_v36, 0.0 }
  0xf3   : > { %v500_v39 = vpop.f32.mrf.mxu0  ;;  %1263 = vmatmul.mubr.msk.bf16.gmra.mxu1 %vm654_vm1, %v613_v34 }
  0xf4   : > { %v501_v40 = vadd.f32 %v1438_v56, %v500_v39  ;;  %v591_v41 = vmax.f32 %v509_v37, 0.0 }
  0xf5   : > { %v1232_v42 = vpop.f32.mrf.mxu0 }
  0xf6   : > { %v589_v44 = vmax.f32 %v501_v40, 0.0  ;;  %v615_v48 = vpack.c.bf16 %v591_v41, %v590_v45  ;;  %v522_v52 = vadd.f32 %v1232_v42, %v1438_v56  ;;  %v1491_v40 = vld [vmem:[%s1674_s4] ss:$0 sm:$0xff] }
  0xf7   : > { %v513_v46 = vpop.f32.mrf.mxu0 }
  0xf8   : > { %v614_v47 = vpack.c.bf16 %v589_v44, %v588_v43  ;;  %v514_v50 = vadd.f32 %v1438_v56, %v513_v46  ;;  %v594_v60 = vmax.f32 %v522_v52, 0.0 }
  0xf9   : > { %v1233_v49 = vpop.f32.mrf.mxu0 }
  0xfa   : > { %v525_v51 = vadd.f32 %v1233_v49, %v1438_v56  ;;  %1266 = vmatprep.mubr.msk.bf16.mxu1 %vm654_vm1, %v614_v47  ;;  %v592_v58 = vmax.f32 %v514_v50, 0.0 }
  0xfb   : > { %v516_v53 = vpop.f32.mrf.mxu0  ;;  %1267 = vmatmul.mubr.msk.bf16.gmra.mxu1 %vm654_vm1, %v615_v48 }
  0xfc   : > { %v517_v54 = vadd.f32 %v1438_v56, %v516_v53  ;;  %v595_v55 = vmax.f32 %v525_v51, 0.0 }
  0xfd   : > { %v1236_v57 = vpop.f32.mrf.mxu0 }
  0xfe   : > { %v593_v59 = vmax.f32 %v517_v54, 0.0  ;;  %v617_v63 = vpack.c.bf16 %v595_v55, %v594_v60  ;;  %v538_v3 = vadd.f32 %v1236_v57, %v1438_v56 }
  0xff   : > { %v529_v61 = vpop.f32.mrf.mxu0 }
 0x100   : > { %v616_v62 = vpack.c.bf16 %v593_v59, %v592_v58  ;;  %v530_v1 = vadd.f32 %v1438_v56, %v529_v61  ;;  %v598_v10 = vmax.f32 %v538_v3, 0.0 }
 0x101   : > { %v1237_v0 = vpop.f32.mrf.mxu0 }
 0x102   : > { %v541_v2 = vadd.f32 %v1237_v0, %v1438_v56  ;;  %1270 = vmatprep.mubr.msk.bf16.mxu1 %vm654_vm1, %v616_v62  ;;  %v596_v8 = vmax.f32 %v530_v1, 0.0 }
 0x103   : > { %v532_v4 = vpop.f32.mrf.mxu0  ;;  %1271 = vmatmul.mubr.msk.bf16.gmra.mxu1 %vm654_vm1, %v617_v63 }
 0x104   : > { %v533_v5 = vadd.f32 %v1438_v56, %v532_v4  ;;  %v599_v6 = vmax.f32 %v541_v2, 0.0 }
 0x105   : > { %v1240_v7 = vpop.f32.mrf.mxu0 }
 0x106   : > { %v597_v9 = vmax.f32 %v533_v5, 0.0  ;;  %v619_v13 = vpack.c.bf16 %v599_v6, %v598_v10  ;;  %v554_v17 = vadd.f32 %v1240_v7, %v1438_v56 }
 0x107   : > { %v545_v11 = vpop.f32.mrf.mxu0 }
 0x108   : > { %v618_v12 = vpack.c.bf16 %v597_v9, %v596_v8  ;;  %v546_v15 = vadd.f32 %v1438_v56, %v545_v11  ;;  %v602_v24 = vmax.f32 %v554_v17, 0.0 }
 0x109   : > { %v1241_v14 = vpop.f32.mrf.mxu0 }
 0x10a   : > { %v557_v16 = vadd.f32 %v1241_v14, %v1438_v56  ;;  %1274 = vmatprep.mubr.msk.bf16.mxu1 %vm654_vm1, %v618_v12  ;;  %v600_v22 = vmax.f32 %v546_v15, 0.0 }
 0x10b   : > { %v548_v18 = vpop.f32.mrf.mxu0  ;;  %1275 = vmatmul.mubr.msk.bf16.gmra.mxu1 %vm654_vm1, %v619_v13 }
 0x10c   : > { %v549_v19 = vadd.f32 %v1438_v56, %v548_v18  ;;  %v603_v20 = vmax.f32 %v557_v16, 0.0 }
 0x10d   : > { %v1244_v21 = vpop.f32.mrf.mxu0 }
 0x10e   : > { %v601_v23 = vmax.f32 %v549_v19, 0.0  ;;  %v621_v27 = vpack.c.bf16 %v603_v20, %v602_v24  ;;  %v570_v31 = vadd.f32 %v1244_v21, %v1438_v56 }
 0x10f   : > { %v561_v25 = vpop.f32.mrf.mxu0 }
 0x110   : > { %v620_v26 = vpack.c.bf16 %v601_v23, %v600_v22  ;;  %v562_v29 = vadd.f32 %v1438_v56, %v561_v25  ;;  %v606_v37 = vmax.f32 %v570_v31, 0.0 }
 0x111   : > { %v1245_v28 = vpop.f32.mrf.mxu0 }
 0x112   : > { %v573_v30 = vadd.f32 %v1245_v28, %v1438_v56  ;;  %1278 = vmatprep.mubr.msk.bf16.mxu1 %vm654_vm1, %v620_v26  ;;  %v604_v35 = vmax.f32 %v562_v29, 0.0 }
 0x113   : > { %v564_v32 = vpop.f32.mrf.mxu0  ;;  %1279 = vmatmul.mubr.msk.bf16.gmra.mxu1 %vm654_vm1, %v621_v27 }
 0x114   : > { %v565_v33 = vadd.f32 %v1438_v56, %v564_v32  ;;  %v607_v34 = vmax.f32 %v573_v30, 0.0  ;;  %v1497_v56 = vld [vmem:[%s1675_s5] ss:$0 sm:$0xff] }
 0x116   : > { %v605_v36 = vmax.f32 %v565_v33, 0.0  ;;  %v623_v39 = vpack.c.bf16 %v607_v34, %v606_v37 }
 0x118   : > { %v622_v38 = vpack.c.bf16 %v605_v36, %v604_v35 }
 0x11a   : > { %1282 = vmatprep.mubr.msk.bf16.mxu1 %vm654_vm1, %v622_v38 }
 0x11b   : > { %1283 = vmatmul.mubr.msk.bf16.gmra.mxu1 %vm654_vm1, %v623_v39 }
 0x1a3   : > { %v1256_v41 = vpop.f32.mrf.mxu1 }
 0x1a4   : > { %v746_v42 = vadd.f32 %v1256_v41, %v1491_v40 }
 0x1a5   : > { %v737_v43 = vpop.f32.mrf.mxu1 }
 0x1a6   : > { %v866_v44 = vmax.f32 %v746_v42, 0.0  ;;  %v738_v45 = vadd.f32 %v1491_v40, %v737_v43 }
 0x1a7   : > { %v1257_v46 = vpop.f32.mrf.mxu1 }
 0x1a8   : > { %v864_v47 = vmax.f32 %v738_v45, 0.0  ;;  %v749_v48 = vadd.f32 %v1257_v46, %v1491_v40  ;;  %v904_v49 = vmul.f32 %v1497_v56, %v866_v44 }
 0x1a9   : > { %v740_v50 = vpop.f32.mrf.mxu1 }
 0x1aa   : > { %v867_v51 = vmax.f32 %v749_v48, 0.0  ;;  %v741_v52 = vadd.f32 %v1491_v40, %v740_v50  ;;  %938 = vadd.xlane.f32.xlu1 %v904_v49  ;;  %v902_v53 = vmul.f32 %v1497_v56, %v864_v47 }
 0x1ab   : > { %v1260_v54 = vpop.f32.mrf.mxu1 }
 0x1ac   : > { %v865_v55 = vmax.f32 %v741_v52, 0.0  ;;  %v762_v57 = vadd.f32 %v1260_v54, %v1491_v40  ;;  %934 = vadd.xlane.f32.xlu0 %v902_v53  ;;  %v905_v58 = vmul.f32 %v1497_v56, %v867_v51 }
 0x1ad   : > { %v753_v59 = vpop.f32.mrf.mxu1 }
 0x1ae   : > { %v870_v60 = vmax.f32 %v762_v57, 0.0  ;;  %v754_v61 = vadd.f32 %v1491_v40, %v753_v59  ;;  %940 = vadd.xlane.f32.xlu1 %v905_v58  ;;  %v903_v62 = vmul.f32 %v1497_v56, %v865_v55 }
 0x1af   : > { %v1261_v63 = vpop.f32.mrf.mxu1 }
 0x1b0   : > { %v765_v0 = vadd.f32 %v1261_v63, %v1491_v40  ;;  %936 = vadd.xlane.f32.xlu0 %v903_v62  ;;  %v868_v2 = vmax.f32 %v754_v61, 0.0  ;;  %v908_v5 = vmul.f32 %v1497_v56, %v870_v60 }
 0x1b1   : > { %v756_v1 = vpop.f32.mrf.mxu1 }
 0x1b2   : > { %v871_v3 = vmax.f32 %v765_v0, 0.0  ;;  %v757_v4 = vadd.f32 %v1491_v40, %v756_v1  ;;  %v906_v13 = vmul.f32 %v1497_v56, %v868_v2 }
 0x1b3   : > { %v1264_v6 = vpop.f32.mrf.mxu1 }
 0x1b4   : > { %v869_v7 = vmax.f32 %v757_v4, 0.0  ;;  %v778_v8 = vadd.f32 %v1264_v6, %v1491_v40  ;;  %946 = vadd.xlane.f32.xlu0 %v908_v5  ;;  %v909_v9 = vmul.f32 %v1497_v56, %v871_v3 }
 0x1b5   : > { %v769_v10 = vpop.f32.mrf.mxu1 }
 0x1b6   : > { %v874_v11 = vmax.f32 %v778_v8, 0.0  ;;  %v770_v12 = vadd.f32 %v1491_v40, %v769_v10  ;;  %948 = vadd.xlane.f32.xlu1 %v909_v9  ;;  %v907_v16 = vmul.f32 %v1497_v56, %v869_v7 }
 0x1b7   : > { %v1265_v14 = vpop.f32.mrf.mxu1 }
 0x1b8   : > { %v781_v15 = vadd.f32 %v1265_v14, %v1491_v40  ;;  %942 = vadd.xlane.f32.xlu0 %v906_v13  ;;  %v872_v18 = vmax.f32 %v770_v12, 0.0  ;;  %v912_v21 = vmul.f32 %v1497_v56, %v874_v11 }
 0x1b9   : > { %v772_v17 = vpop.f32.mrf.mxu1 }
 0x1ba   : > { %v875_v19 = vmax.f32 %v781_v15, 0.0  ;;  %v773_v20 = vadd.f32 %v1491_v40, %v772_v17  ;;  %944 = vadd.xlane.f32.xlu1 %v907_v16  ;;  %v910_v29 = vmul.f32 %v1497_v56, %v872_v18 }
 0x1bb   : > { %v1268_v22 = vpop.f32.mrf.mxu1 }
 0x1bc   : > { %v873_v23 = vmax.f32 %v773_v20, 0.0  ;;  %v794_v24 = vadd.f32 %v1268_v22, %v1491_v40  ;;  %954 = vadd.xlane.f32.xlu0 %v912_v21  ;;  %v913_v25 = vmul.f32 %v1497_v56, %v875_v19 }
 0x1bd   : > { %v785_v26 = vpop.f32.mrf.mxu1 }
 0x1be   : > { %v878_v27 = vmax.f32 %v794_v24, 0.0  ;;  %v786_v28 = vadd.f32 %v1491_v40, %v785_v26  ;;  %956 = vadd.xlane.f32.xlu1 %v913_v25  ;;  %v911_v32 = vmul.f32 %v1497_v56, %v873_v23 }
 0x1bf   : > { %v1269_v30 = vpop.f32.mrf.mxu1 }
 0x1c0   : > { %v797_v31 = vadd.f32 %v1269_v30, %v1491_v40  ;;  %950 = vadd.xlane.f32.xlu0 %v910_v29  ;;  %v876_v34 = vmax.f32 %v786_v28, 0.0  ;;  %v916_v37 = vmul.f32 %v1497_v56, %v878_v27 }
 0x1c1   : > { %v788_v33 = vpop.f32.mrf.mxu1 }
 0x1c2   : > { %v879_v35 = vmax.f32 %v797_v31, 0.0  ;;  %v789_v36 = vadd.f32 %v1491_v40, %v788_v33  ;;  %952 = vadd.xlane.f32.xlu1 %v911_v32  ;;  %v914_v46 = vmul.f32 %v1497_v56, %v876_v34 }
 0x1c3   : > { %v1272_v38 = vpop.f32.mrf.mxu1 }
 0x1c4   : > { %v877_v39 = vmax.f32 %v789_v36, 0.0  ;;  %v810_v41 = vadd.f32 %v1272_v38, %v1491_v40  ;;  %962 = vadd.xlane.f32.xlu0 %v916_v37  ;;  %v917_v42 = vmul.f32 %v1497_v56, %v879_v35 }
 0x1c5   : > { %v801_v43 = vpop.f32.mrf.mxu1 }
 0x1c6   : > { %v882_v44 = vmax.f32 %v810_v41, 0.0  ;;  %v802_v45 = vadd.f32 %v1491_v40, %v801_v43  ;;  %964 = vadd.xlane.f32.xlu1 %v917_v42  ;;  %v915_v49 = vmul.f32 %v1497_v56, %v877_v39 }
 0x1c7   : > { %v1273_v47 = vpop.f32.mrf.mxu1 }
 0x1c8   : > { %v813_v48 = vadd.f32 %v1273_v47, %v1491_v40  ;;  %958 = vadd.xlane.f32.xlu0 %v914_v46  ;;  %v880_v51 = vmax.f32 %v802_v45, 0.0  ;;  %v920_v54 = vmul.f32 %v1497_v56, %v882_v44  ;;  %v1562_v45 = vstv %s299_s28 }
 0x1c9   : > { %v804_v50 = vpop.f32.mrf.mxu1 }
 0x1ca   : > { %v883_v52 = vmax.f32 %v813_v48, 0.0  ;;  %v805_v53 = vadd.f32 %v1491_v40, %v804_v50  ;;  %960 = vadd.xlane.f32.xlu1 %v915_v49  ;;  %v918_v63 = vmul.f32 %v1497_v56, %v880_v51 }
 0x1cb   : > { %v1276_v55 = vpop.f32.mrf.mxu1 }
 0x1cc   : > { %v881_v57 = vmax.f32 %v805_v53, 0.0  ;;  %v826_v58 = vadd.f32 %v1276_v55, %v1491_v40  ;;  %970 = vadd.xlane.f32.xlu0 %v920_v54  ;;  %v921_v59 = vmul.f32 %v1497_v56, %v883_v52 }
 0x1cd   : > { %v817_v60 = vpop.f32.mrf.mxu1 }
 0x1ce   : > { %v886_v61 = vmax.f32 %v826_v58, 0.0  ;;  %v818_v62 = vadd.f32 %v1491_v40, %v817_v60  ;;  %972 = vadd.xlane.f32.xlu1 %v921_v59  ;;  %v919_v2 = vmul.f32 %v1497_v56, %v881_v57 }
 0x1cf   : > { %v1277_v0 = vpop.f32.mrf.mxu1 }
 0x1d0   : > { %v829_v1 = vadd.f32 %v1277_v0, %v1491_v40  ;;  %966 = vadd.xlane.f32.xlu0 %v918_v63  ;;  %v884_v4 = vmax.f32 %v818_v62, 0.0  ;;  %v924_v7 = vmul.f32 %v1497_v56, %v886_v61 }
 0x1d1   : > { %v820_v3 = vpop.f32.mrf.mxu1 }
 0x1d2   : > { %v887_v5 = vmax.f32 %v829_v1, 0.0  ;;  %v821_v6 = vadd.f32 %v1491_v40, %v820_v3  ;;  %968 = vadd.xlane.f32.xlu1 %v919_v2  ;;  %v922_v15 = vmul.f32 %v1497_v56, %v884_v4 }
 0x1d3   : > { %v1280_v8 = vpop.f32.mrf.mxu1 }
 0x1d4   : > { %v885_v9 = vmax.f32 %v821_v6, 0.0  ;;  %v842_v10 = vadd.f32 %v1280_v8, %v1491_v40  ;;  %978 = vadd.xlane.f32.xlu0 %v924_v7  ;;  %v925_v11 = vmul.f32 %v1497_v56, %v887_v5 }
 0x1d5   : > { %v833_v12 = vpop.f32.mrf.mxu1 }
 0x1d6   : > { %v890_v13 = vmax.f32 %v842_v10, 0.0  ;;  %v834_v14 = vadd.f32 %v1491_v40, %v833_v12  ;;  %980 = vadd.xlane.f32.xlu1 %v925_v11  ;;  %v923_v18 = vmul.f32 %v1497_v56, %v885_v9 }
 0x1d7   : > { %v1281_v16 = vpop.f32.mrf.mxu1 }
 0x1d8   : > { %v845_v17 = vadd.f32 %v1281_v16, %v1491_v40  ;;  %974 = vadd.xlane.f32.xlu0 %v922_v15  ;;  %v888_v20 = vmax.f32 %v834_v14, 0.0  ;;  %v928_v23 = vmul.f32 %v1497_v56, %v890_v13 }
 0x1d9   : > { %v836_v19 = vpop.f32.mrf.mxu1 }
 0x1da   : > { %v891_v21 = vmax.f32 %v845_v17, 0.0  ;;  %v837_v22 = vadd.f32 %v1491_v40, %v836_v19  ;;  %976 = vadd.xlane.f32.xlu1 %v923_v18  ;;  %v926_v30 = vmul.f32 %v1497_v56, %v888_v20 }
 0x1db   : > { %v1284_v24 = vpop.f32.mrf.mxu1 }
 0x1dc   : > { %v889_v25 = vmax.f32 %v837_v22, 0.0  ;;  %986 = vadd.xlane.f32.xlu0 %v928_v23  ;;  %v929_v26 = vmul.f32 %v1497_v56, %v891_v21  ;;  %v858_v28 = vadd.f32 %v1284_v24, %v1491_v40 }
 0x1dd   : > { %v849_v27 = vpop.f32.mrf.mxu1 }
 0x1de   : > { %v850_v29 = vadd.f32 %v1491_v40, %v849_v27  ;;  %988 = vadd.xlane.f32.xlu1 %v929_v26  ;;  %v927_v34 = vmul.f32 %v1497_v56, %v889_v25  ;;  %v894_v36 = vmax.f32 %v858_v28, 0.0 }
 0x1df   : > { %v1285_v31 = vpop.f32.mrf.mxu1 }
 0x1e0   : > { %v892_v32 = vmax.f32 %v850_v29, 0.0  ;;  %v861_v33 = vadd.f32 %v1285_v31, %v1491_v40  ;;  %982 = vadd.xlane.f32.xlu0 %v926_v30  ;;  %v932_v44 = vmul.f32 %v1497_v56, %v894_v36 }
 0x1e1   : > { %v852_v35 = vpop.f32.mrf.mxu1 }
 0x1e2   : > { %v895_v37 = vmax.f32 %v861_v33, 0.0  ;;  %v853_v38 = vadd.f32 %v1491_v40, %v852_v35  ;;  %984 = vadd.xlane.f32.xlu1 %v927_v34  ;;  %v930_v39 = vmul.f32 %v1497_v56, %v892_v32 }
 0x1e4   : > { %v893_v41 = vmax.f32 %v853_v38, 0.0  ;;  %990 = vadd.xlane.f32.xlu0 %v930_v39  ;;  %v933_v42 = vmul.f32 %v1497_v56, %v895_v37 }
 0x1e6   : > { %v931_v43 = vmul.f32 %v1497_v56, %v893_v41 }
 0x1e8   : > { %992 = vadd.xlane.f32.xlu1 %v931_v43  ;;  %994 = vadd.xlane.f32.xlu0 %v932_v44 }
 0x1ec   : > { %996 = vadd.xlane.f32.xlu1 %v933_v42 }
 0x233   : > { %v939_v40 = vpop.xlane.xlu1 %938 }
 0x234   : > { %v1001_v56 = vadd.f32 %v1562_v45, %v939_v40 }
 0x235   : > { %v935_v46 = vpop.xlane.xlu0 %934 }
 0x236   : > { %1034 = vst.msk [vmem:[%s1569_s8 + $0x10] sm:$0xff] %vm1031_vm2, %v1001_v56  ;;  %v999_v47 = vadd.f32 %v1562_v45, %v935_v46 }
 0x237   : > { %v941_v48 = vpop.xlane.xlu1 %940 }
 0x238   : > { %1032 = vst.msk [vmem:[%s1569_s8] sm:$0xff] %vm1031_vm2, %v999_v47  ;;  %v1002_v49 = vadd.f32 %v1562_v45, %v941_v48 }
 0x239   : > { %v937_v50 = vpop.xlane.xlu0 %936 }
 0x23a   : > { %1035 = vst.msk [vmem:[%s1569_s8 + $0x18] sm:$0xff] %vm1031_vm2, %v1002_v49  ;;  %v1000_v51 = vadd.f32 %v1562_v45, %v937_v50 }
 0x23c   : > { %1033 = vst.msk [vmem:[%s1569_s8 + $0x8] sm:$0xff] %vm1031_vm2, %v1000_v51 }
 0x23d   : > { %v947_v52 = vpop.xlane.xlu0 %946 }
 0x23e   : > { %v1005_v53 = vadd.f32 %v1562_v45, %v947_v52 }
 0x23f   : > { %v949_v54 = vpop.xlane.xlu1 %948 }
 0x240   : > { %1038 = vst.msk [vmem:[%s1569_s8 + $0x30] sm:$0xff] %vm1031_vm2, %v1005_v53  ;;  %v1006_v55 = vadd.f32 %v1562_v45, %v949_v54 }
 0x241   : > { %v943_v57 = vpop.xlane.xlu0 %942 }
 0x242   : > { %1039 = vst.msk [vmem:[%s1569_s8 + $0x38] sm:$0xff] %vm1031_vm2, %v1006_v55  ;;  %v1003_v58 = vadd.f32 %v1562_v45, %v943_v57 }
 0x243   : > { %v945_v59 = vpop.xlane.xlu1 %944 }
 0x244   : > { %1036 = vst.msk [vmem:[%s1569_s8 + $0x20] sm:$0xff] %vm1031_vm2, %v1003_v58  ;;  %v1004_v60 = vadd.f32 %v1562_v45, %v945_v59 }
 0x245   : > { %v955_v61 = vpop.xlane.xlu0 %954 }
 0x246   : > { %1037 = vst.msk [vmem:[%s1569_s8 + $0x28] sm:$0xff] %vm1031_vm2, %v1004_v60  ;;  %v1009_v62 = vadd.f32 %v1562_v45, %v955_v61 }
 0x247   : > { %v957_v63 = vpop.xlane.xlu1 %956 }
 0x248   : > { %1042 = vst.msk [vmem:[%s1569_s8 + $0x50] sm:$0xff] %vm1031_vm2, %v1009_v62  ;;  %v1010_v0 = vadd.f32 %v1562_v45, %v957_v63 }
 0x249   : > { %v951_v1 = vpop.xlane.xlu0 %950 }
 0x24a   : > { %1043 = vst.msk [vmem:[%s1569_s8 + $0x58] sm:$0xff] %vm1031_vm2, %v1010_v0  ;;  %v1007_v2 = vadd.f32 %v1562_v45, %v951_v1 }
 0x24b   : > { %v953_v3 = vpop.xlane.xlu1 %952 }
 0x24c   : > { %1040 = vst.msk [vmem:[%s1569_s8 + $0x40] sm:$0xff] %vm1031_vm2, %v1007_v2  ;;  %v1008_v4 = vadd.f32 %v1562_v45, %v953_v3 }
 0x24d   : > { %v963_v5 = vpop.xlane.xlu0 %962 }
 0x24e   : > { %1041 = vst.msk [vmem:[%s1569_s8 + $0x48] sm:$0xff] %vm1031_vm2, %v1008_v4  ;;  %v1013_v6 = vadd.f32 %v1562_v45, %v963_v5 }
 0x24f   : > { %v965_v7 = vpop.xlane.xlu1 %964 }
 0x250   : > { %1046 = vst.msk [vmem:[%s1569_s8 + $0x70] sm:$0xff] %vm1031_vm2, %v1013_v6  ;;  %v1014_v8 = vadd.f32 %v1562_v45, %v965_v7 }
 0x251   : > { %v959_v9 = vpop.xlane.xlu0 %958 }
 0x252   : > { %1047 = vst.msk [vmem:[%s1569_s8 + $0x78] sm:$0xff] %vm1031_vm2, %v1014_v8  ;;  %v1011_v10 = vadd.f32 %v1562_v45, %v959_v9 }
 0x253   : > { %v961_v11 = vpop.xlane.xlu1 %960 }
 0x254   : > { %1044 = vst.msk [vmem:[%s1569_s8 + $0x60] sm:$0xff] %vm1031_vm2, %v1011_v10  ;;  %v1012_v12 = vadd.f32 %v1562_v45, %v961_v11 }
 0x255   : > { %v971_v13 = vpop.xlane.xlu0 %970 }
 0x256   : > { %1045 = vst.msk [vmem:[%s1569_s8 + $0x68] sm:$0xff] %vm1031_vm2, %v1012_v12  ;;  %v1017_v14 = vadd.f32 %v1562_v45, %v971_v13 }
 0x257   : > { %v973_v15 = vpop.xlane.xlu1 %972 }
 0x258   : > { %1050 = vst.msk [vmem:[%s1569_s8 + $0x90] sm:$0xff] %vm1031_vm2, %v1017_v14  ;;  %v1018_v16 = vadd.f32 %v1562_v45, %v973_v15 }
 0x259   : > { %v967_v17 = vpop.xlane.xlu0 %966 }
 0x25a   : > { %1051 = vst.msk [vmem:[%s1569_s8 + $0x98] sm:$0xff] %vm1031_vm2, %v1018_v16  ;;  %v1015_v18 = vadd.f32 %v1562_v45, %v967_v17 }
 0x25b   : > { %v969_v19 = vpop.xlane.xlu1 %968 }
 0x25c   : > { %1048 = vst.msk [vmem:[%s1569_s8 + $0x80] sm:$0xff] %vm1031_vm2, %v1015_v18  ;;  %v1016_v20 = vadd.f32 %v1562_v45, %v969_v19 }
 0x25d   : > { %v979_v21 = vpop.xlane.xlu0 %978 }
 0x25e   : > { %1049 = vst.msk [vmem:[%s1569_s8 + $0x88] sm:$0xff] %vm1031_vm2, %v1016_v20  ;;  %v1021_v22 = vadd.f32 %v1562_v45, %v979_v21 }
 0x25f   : > { %v981_v23 = vpop.xlane.xlu1 %980 }
 0x260   : > { %1054 = vst.msk [vmem:[%s1569_s8 + $0xb0] sm:$0xff] %vm1031_vm2, %v1021_v22  ;;  %v1022_v24 = vadd.f32 %v1562_v45, %v981_v23 }
 0x261   : > { %v975_v25 = vpop.xlane.xlu0 %974 }
 0x262   : > { %1055 = vst.msk [vmem:[%s1569_s8 + $0xb8] sm:$0xff] %vm1031_vm2, %v1022_v24  ;;  %v1019_v26 = vadd.f32 %v1562_v45, %v975_v25 }
 0x263   : > { %v977_v27 = vpop.xlane.xlu1 %976 }
 0x264   : > { %1052 = vst.msk [vmem:[%s1569_s8 + $0xa0] sm:$0xff] %vm1031_vm2, %v1019_v26  ;;  %v1020_v28 = vadd.f32 %v1562_v45, %v977_v27 }
 0x265   : > { %v987_v29 = vpop.xlane.xlu0 %986 }
 0x266   : > { %1053 = vst.msk [vmem:[%s1569_s8 + $0xa8] sm:$0xff] %vm1031_vm2, %v1020_v28  ;;  %v1025_v30 = vadd.f32 %v1562_v45, %v987_v29 }
 0x267   : > { %v989_v31 = vpop.xlane.xlu1 %988 }
 0x268   : > { %1058 = vst.msk [vmem:[%s1569_s8 + $0xd0] sm:$0xff] %vm1031_vm2, %v1025_v30  ;;  %v1026_v32 = vadd.f32 %v1562_v45, %v989_v31 }
 0x269   : > { %v983_v33 = vpop.xlane.xlu0 %982 }
 0x26a   : > { %1059 = vst.msk [vmem:[%s1569_s8 + $0xd8] sm:$0xff] %vm1031_vm2, %v1026_v32  ;;  %v1023_v34 = vadd.f32 %v1562_v45, %v983_v33 }
 0x26b   : > { %v985_v35 = vpop.xlane.xlu1 %984 }
 0x26c   : > { %1056 = vst.msk [vmem:[%s1569_s8 + $0xc0] sm:$0xff] %vm1031_vm2, %v1023_v34  ;;  %v1024_v36 = vadd.f32 %v1562_v45, %v985_v35 }
 0x26d   : > { %v991_v37 = vpop.xlane.xlu0 %990 }
 0x26e   : > { %1057 = vst.msk [vmem:[%s1569_s8 + $0xc8] sm:$0xff] %vm1031_vm2, %v1024_v36  ;;  %v1027_v38 = vadd.f32 %v1562_v45, %v991_v37 }
 0x270   : > { %1060 = vst.msk [vmem:[%s1569_s8 + $0xe0] sm:$0xff] %vm1031_vm2, %v1027_v38 }
 0x271   : > { %v993_v39 = vpop.xlane.xlu1 %992  ;;  %v995_v41 = vpop.xlane.xlu0 %994 }
 0x272   : > { %v1028_v42 = vadd.f32 %v1562_v45, %v993_v39  ;;  %v1029_v43 = vadd.f32 %v1562_v45, %v995_v41 }
 0x274   : > { %1061 = vst.msk [vmem:[%s1569_s8 + $0xe8] sm:$0xff] %vm1031_vm2, %v1028_v42  ;;  %1062 = vst.msk [vmem:[%s1569_s8 + $0xf0] sm:$0xff] %vm1031_vm2, %v1029_v43 }
 0x275   : > { %v997_v44 = vpop.xlane.xlu1 %996 }
 0x276   : > { %v1030_v40 = vadd.f32 %v1562_v45, %v997_v44 }
 0x278   : > { %1063 = vst.msk [vmem:[%s1569_s8 + $0xf8] sm:$0xff] %vm1031_vm2, %v1030_v40 }
 0x279 PF: > { %s18_s26 = sadd.s32 1, %s1306_s26  }
 0x27a   : > { %p15_p4 = scmp.ge.s32.totalorder %s18_s26, 4  }
 0x27c   :  { %17 = sbr.rel (!%p15_p4) target bundleno = 2 (0x2), region = 78 }

</bundles_post_ra>
